<compile_context>
chip_gen: v7x
topology: tpu7x:2x2x1
jax: 0.10.0
libtpu: 0.0.40
codegen_flags: <defaults>
</compile_context>

<pallas_src>
import jax
import jax.numpy as jnp
from jax.experimental import pallas as pl
from jax.experimental.pallas import tpu as pltpu


def _round_up(x: int, m: int) -> int:
    return ((x + m - 1) // m) * m


def fusion_kernel(x_ref, wb_ref, o_ref):
    # x_ref:  (TB, 8)  input rows for this grid step
    # wb_ref: (9, 4)   rows 0..7 = W (in_features x out_features), row 8 = bias
    # o_ref:  (TB, 4)
    x = x_ref[...]
    wb = wb_ref[...]
    tb = x.shape[0]
    k_in = x.shape[1]

    # Accumulator initialized with the bias row (broadcast over the batch tile).
    y = jnp.broadcast_to(wb[k_in:k_in + 1, :], (tb, wb.shape[1]))

    # 8 unrolled VPU broadcast-FMAs instead of a padded MXU matmul:
    #   y += x[:, k] (outer) w[k, :]
    for k in range(k_in):
        y = y + x[:, k:k + 1] * wb[k:k + 1, :]

    o_ref[...] = jax.nn.sigmoid(y).astype(o_ref.dtype)


def fusion_forward(x, w, b, *, tile_b: int = 512):
    """Forward pass of FUSION: sigmoid(x @ W + b).

    x: (B, 8) float32
    w: (8, 4) float32   (stored as in_features x out_features)
    b: (4,)   float32
    returns (B, 4) float32
    """
    B, K = x.shape
    N = w.shape[1]

    # Augment weights with the bias as an extra row: [W; b] -> (K+1, N).
    wb = jnp.concatenate([w, b.reshape(1, N)], axis=0).astype(jnp.float32)

    # Batch tile: multiple of 8 (sublane), capped at tile_b.
    tb = min(tile_b, _round_up(B, 8))
    b_pad = _round_up(B, tb)
    if b_pad != B:
        x = jnp.pad(x, ((0, b_pad - B), (0, 0)))

    grid = (b_pad // tb,)

    out = pl.pallas_call(
        fusion_kernel,
        out_shape=jax.ShapeDtypeStruct((b_pad, N), jnp.float32),
        grid_spec=pl.GridSpec(
            grid=grid,
            in_specs=[
                # Streamed batch tiles.
                pl.BlockSpec((tb, K), lambda i: (i, 0)),
                # Constant-index block: the (9, 4) [W; b] stays VMEM-resident.
                pl.BlockSpec((K + 1, N), lambda i: (0, 0)),
            ],
            out_specs=pl.BlockSpec((tb, N), lambda i: (i, 0)),
        ),
        compiler_params=pltpu.CompilerParams(
            dimension_semantics=("parallel",),
        ),
    )(x, wb)

    if b_pad != B:
        out = out[:B]
    return out


def reference_forward(x, w, b):
    return jax.nn.sigmoid(x @ w + b[None, :])


if __name__ == "__main__":
    key = jax.random.PRNGKey(0)
    kx, kw, kb = jax.random.split(key, 3)

    batch = 16
    x = jax.random.normal(kx, (batch, 8), dtype=jnp.float32)

    # Deterministic parameter init (mimics nn.Linear uniform(-1/sqrt(8), 1/sqrt(8)))
    bound = 1.0 / jnp.sqrt(8.0)
    w = jax.random.uniform(kw, (8, 4), minval=-bound, maxval=bound, dtype=jnp.float32)
    b = jax.random.uniform(kb, (4,), minval=-bound, maxval=bound, dtype=jnp.float32)

    out = fusion_forward(x, w, b)
    out = jax.block_until_ready(out)

    ref = reference_forward(x, w, b)
    assert out.shape == (batch, 4)
    assert jnp.allclose(out, ref, atol=1e-5, rtol=1e-5)

    print("KERNEL_OK")
</pallas_src>

<mosaic_0001>
module attributes {stable_mosaic.version = 11 : i64} {
  func.func @fusion_kernel(%arg0: i32, %arg1: memref<16x8xf32, #tpu.memory_space<vmem>>, %arg2: memref<9x4xf32, #tpu.memory_space<vmem>>, %arg3: memref<16x4xf32, #tpu.memory_space<vmem>>) attributes {dimension_semantics = [#tpu.dimension_semantics<parallel>], iteration_bounds = array<i64: 1>, scalar_prefetch = 0 : i64, scratch_operands = 0 : i64, tpu.core_type = #tpu.core_type<tc>, window_params = [{transform_indices = @transform_0, window_bounds = array<i64: 16, 8>}, {pipeline_mode = #tpu.pipeline_mode<synchronous>, transform_indices = @transform_1, window_bounds = array<i64: 9, 4>}, {transform_indices = @transform_2, window_bounds = array<i64: 16, 4>}]} {
    %c0 = arith.constant 0 : index
    %c0_0 = arith.constant 0 : index
    %0 = vector.load %arg1[%c0, %c0_0] : memref<16x8xf32, #tpu.memory_space<vmem>>, vector<16x8xf32>
    %c0_1 = arith.constant 0 : index
    %c0_2 = arith.constant 0 : index
    %1 = vector.load %arg2[%c0_1, %c0_2] : memref<9x4xf32, #tpu.memory_space<vmem>>, vector<9x4xf32>
    %2 = vector.extract_strided_slice %1 {offsets = [8, 0], sizes = [1, 4], strides = [1, 1]} : vector<9x4xf32> to vector<1x4xf32>
    %3 = vector.shape_cast %2 : vector<1x4xf32> to vector<1x4xf32>
    %4 = vector.broadcast %3 : vector<1x4xf32> to vector<16x4xf32>
    %5 = vector.extract_strided_slice %0 {offsets = [0, 0], sizes = [16, 1], strides = [1, 1]} : vector<16x8xf32> to vector<16x1xf32>
    %6 = vector.extract_strided_slice %1 {offsets = [0, 0], sizes = [1, 4], strides = [1, 1]} : vector<9x4xf32> to vector<1x4xf32>
    %7 = vector.broadcast %5 : vector<16x1xf32> to vector<16x4xf32>
    %8 = vector.broadcast %6 : vector<1x4xf32> to vector<16x4xf32>
    %9 = arith.mulf %7, %8 : vector<16x4xf32>
    %10 = arith.addf %4, %9 : vector<16x4xf32>
    %11 = vector.extract_strided_slice %0 {offsets = [0, 1], sizes = [16, 1], strides = [1, 1]} : vector<16x8xf32> to vector<16x1xf32>
    %12 = vector.extract_strided_slice %1 {offsets = [1, 0], sizes = [1, 4], strides = [1, 1]} : vector<9x4xf32> to vector<1x4xf32>
    %13 = vector.broadcast %11 : vector<16x1xf32> to vector<16x4xf32>
    %14 = vector.broadcast %12 : vector<1x4xf32> to vector<16x4xf32>
    %15 = arith.mulf %13, %14 : vector<16x4xf32>
    %16 = arith.addf %10, %15 : vector<16x4xf32>
    %17 = vector.extract_strided_slice %0 {offsets = [0, 2], sizes = [16, 1], strides = [1, 1]} : vector<16x8xf32> to vector<16x1xf32>
    %18 = vector.extract_strided_slice %1 {offsets = [2, 0], sizes = [1, 4], strides = [1, 1]} : vector<9x4xf32> to vector<1x4xf32>
    %19 = vector.broadcast %17 : vector<16x1xf32> to vector<16x4xf32>
    %20 = vector.broadcast %18 : vector<1x4xf32> to vector<16x4xf32>
    %21 = arith.mulf %19, %20 : vector<16x4xf32>
    %22 = arith.addf %16, %21 : vector<16x4xf32>
    %23 = vector.extract_strided_slice %0 {offsets = [0, 3], sizes = [16, 1], strides = [1, 1]} : vector<16x8xf32> to vector<16x1xf32>
    %24 = vector.extract_strided_slice %1 {offsets = [3, 0], sizes = [1, 4], strides = [1, 1]} : vector<9x4xf32> to vector<1x4xf32>
    %25 = vector.broadcast %23 : vector<16x1xf32> to vector<16x4xf32>
    %26 = vector.broadcast %24 : vector<1x4xf32> to vector<16x4xf32>
    %27 = arith.mulf %25, %26 : vector<16x4xf32>
    %28 = arith.addf %22, %27 : vector<16x4xf32>
    %29 = vector.extract_strided_slice %0 {offsets = [0, 4], sizes = [16, 1], strides = [1, 1]} : vector<16x8xf32> to vector<16x1xf32>
    %30 = vector.extract_strided_slice %1 {offsets = [4, 0], sizes = [1, 4], strides = [1, 1]} : vector<9x4xf32> to vector<1x4xf32>
    %31 = vector.broadcast %29 : vector<16x1xf32> to vector<16x4xf32>
    %32 = vector.broadcast %30 : vector<1x4xf32> to vector<16x4xf32>
    %33 = arith.mulf %31, %32 : vector<16x4xf32>
    %34 = arith.addf %28, %33 : vector<16x4xf32>
    %35 = vector.extract_strided_slice %0 {offsets = [0, 5], sizes = [16, 1], strides = [1, 1]} : vector<16x8xf32> to vector<16x1xf32>
    %36 = vector.extract_strided_slice %1 {offsets = [5, 0], sizes = [1, 4], strides = [1, 1]} : vector<9x4xf32> to vector<1x4xf32>
    %37 = vector.broadcast %35 : vector<16x1xf32> to vector<16x4xf32>
    %38 = vector.broadcast %36 : vector<1x4xf32> to vector<16x4xf32>
    %39 = arith.mulf %37, %38 : vector<16x4xf32>
    %40 = arith.addf %34, %39 : vector<16x4xf32>
    %41 = vector.extract_strided_slice %0 {offsets = [0, 6], sizes = [16, 1], strides = [1, 1]} : vector<16x8xf32> to vector<16x1xf32>
    %42 = vector.extract_strided_slice %1 {offsets = [6, 0], sizes = [1, 4], strides = [1, 1]} : vector<9x4xf32> to vector<1x4xf32>
    %43 = vector.broadcast %41 : vector<16x1xf32> to vector<16x4xf32>
    %44 = vector.broadcast %42 : vector<1x4xf32> to vector<16x4xf32>
    %45 = arith.mulf %43, %44 : vector<16x4xf32>
    %46 = arith.addf %40, %45 : vector<16x4xf32>
    %47 = vector.extract_strided_slice %0 {offsets = [0, 7], sizes = [16, 1], strides = [1, 1]} : vector<16x8xf32> to vector<16x1xf32>
    %48 = vector.extract_strided_slice %1 {offsets = [7, 0], sizes = [1, 4], strides = [1, 1]} : vector<9x4xf32> to vector<1x4xf32>
    %49 = vector.broadcast %47 : vector<16x1xf32> to vector<16x4xf32>
    %50 = vector.broadcast %48 : vector<1x4xf32> to vector<16x4xf32>
    %51 = arith.mulf %49, %50 : vector<16x4xf32>
    %52 = arith.addf %46, %51 : vector<16x4xf32>
    %53 = arith.negf %52 : vector<16x4xf32>
    %54 = math.exp %53 : vector<16x4xf32>
    %cst = arith.constant 1.000000e+00 : f32
    %55 = vector.broadcast %cst : f32 to vector<16x4xf32>
    %56 = arith.addf %55, %54 : vector<16x4xf32>
    %57 = arith.divf %55, %56 : vector<16x4xf32>
    %c0_3 = arith.constant 0 : index
    %c0_4 = arith.constant 0 : index
    %58 = vector.load %arg3[%c0_3, %c0_4] : memref<16x4xf32, #tpu.memory_space<vmem>>, vector<16x4xf32>
    tpu.vector_store %arg3[%c0_3, %c0_4], %57 {strides = array<i32>} : memref<16x4xf32, #tpu.memory_space<vmem>>, vector<16x4xf32>,
    return
  }
  func.func @transform_0(%arg0: i32) -> (i32, i32) {
    %c0_i32 = arith.constant 0 : i32
    %c0_i32_0 = arith.constant 0 : i32
    return %arg0, %c0_i32 : i32, i32
  }
  func.func @transform_1(%arg0: i32) -> (i32, i32) {
    %c0_i32 = arith.constant 0 : i32
    %c0_i32_0 = arith.constant 0 : i32
    %c0_i32_1 = arith.constant 0 : i32
    return %c0_i32, %c0_i32_0 : i32, i32
  }
  func.func @transform_2(%arg0: i32) -> (i32, i32) {
    %c0_i32 = arith.constant 0 : i32
    %c0_i32_0 = arith.constant 0 : i32
    return %arg0, %c0_i32 : i32, i32
  }
}

</mosaic_0001>

<bundles_post_ra>
// kernel: tpu_custom_call.1
= control target key start
LH: loop header
LB: loop body
LE: loop exit
PB: predicated region body
PF: predicated region fallthrough
CT: control target
= control target key end

     0   :  { %v200_v0 = vmov 1   ;;  %v201_v1 = vmov 0   ;;  %v202_v4 = vmov 2   ;;  %v203_v5 = vmov 3   ;;  %s241_s0 = inlined_call_operand.vmem [shape: f32[16,8], index: 0, kind: input, shape index: {}]   ;;  %s242_s1 = inlined_call_operand.vmem [shape: f32[9,4], index: 1, kind: input, shape index: {}]   ;;  %s243_s2 = inlined_call_operand.vmem [shape: f32[16,4], index: 2, kind: output, shape index: {}]  }
   0x1   :  { %180 = vset.pattern.permute.xlu1 %v200_v0  ;;  %179 = vset.pattern.permute.xlu0 %v201_v1  ;;  %v11_v2 = vld [vmem:[%s241_s0] sm:$0xff]  ;;  %v12_v3 = vld [vmem:[%s241_s0 + $0x8] sm:$0xff]  ;;  %v204_v6 = vmov 4   ;;  %v205_v7 = vmov 5   ;;  %v206_v8 = vmov 6   ;;  %v207_v9 = vmov 7  }
   0x2   :  { %38 = vperm.xlu1 %180, %v11_v2   ;;  %21 = vperm.xlu0 %179, %v11_v2   ;;  %v29_v11 = vlaneseq  ;;  %v13_v17 = vld [vmem:[%s242_s1] sm:$0xff]  ;;  %v168_v26 = vld [vmem:[%s242_s1 + $0x8] ss:$0 sm:$0xff]  ;;  %vm161_vm0 = vcmask 31744  }
   0x4   :  { %v30_v13 = vshrl.u32 %v29_v11, 7 }
   0x6   :  { %42 = vperm.xlu1 %180, %v12_v3   ;;  %26 = vperm.xlu0 %179, %v12_v3   ;;  %v31_v16 = vsub.s32 0, %v30_v13  ;;  %v47_v21 = vsub.s32 1, %v30_v13  ;;  %v63_v22 = vsub.s32 2, %v30_v13  ;;  %v79_v24 = vsub.s32 3, %v30_v13 }
   0x7   :  { %v95_v31 = vsub.s32 4, %v30_v13  ;;  %v111_v35 = vsub.s32 5, %v30_v13  ;;  %v127_v46 = vsub.s32 6, %v30_v13  ;;  %v143_v54 = vsub.s32 7, %v30_v13 }
   0x8   :  { %v32_v20 = vrot.slane %v13_v17, %v31_v16  ;;  %v48_v28 = vrot.slane %v13_v17, %v47_v21  ;;  %v64_v30 = vrot.slane %v13_v17, %v63_v22  ;;  %v80_v33 = vrot.slane %v13_v17, %v79_v24 }
   0x9   :  { %v96_v39 = vrot.slane %v13_v17, %v95_v31  ;;  %v112_v44 = vrot.slane %v13_v17, %v111_v35  ;;  %v128_v55 = vrot.slane %v13_v17, %v127_v46  ;;  %v144_v0 = vrot.slane %v13_v17, %v143_v54 }
   0xa   :  { %182 = vset.pattern.permute.xlu1 %v202_v4  ;;  %181 = vset.pattern.permute.xlu0 %v202_v4 }
   0xb   :  { %58 = vperm.xlu1 %182, %v12_v3   ;;  %54 = vperm.xlu0 %181, %v11_v2  }
   0xf   :  { %183 = vset.pattern.permute.xlu1 %v203_v5  ;;  %184 = vset.pattern.permute.xlu0 %v203_v5 }
  0x10   :  { %70 = vperm.xlu1 %183, %v11_v2   ;;  %74 = vperm.xlu0 %184, %v12_v3  }
  0x14   :  { %185 = vset.pattern.permute.xlu1 %v204_v6  ;;  %186 = vset.pattern.permute.xlu0 %v205_v7 }
  0x15   :  { %86 = vperm.xlu1 %185, %v11_v2   ;;  %102 = vperm.xlu0 %186, %v11_v2  }
  0x19   :  { %90 = vperm.xlu1 %185, %v12_v3   ;;  %189 = vset.pattern.permute.xlu0 %v206_v8 }
  0x1a   :  { %122 = vperm.xlu0 %189, %v12_v3  }
  0x1d   :  { %187 = vset.pattern.permute.xlu1 %v205_v7 }
  0x1e   :  { %106 = vperm.xlu1 %187, %v12_v3   ;;  %191 = vset.pattern.permute.xlu0 %v207_v9 }
  0x22   :  { %188 = vset.pattern.permute.xlu1 %v206_v8 }
  0x23   :  { %118 = vperm.xlu1 %188, %v11_v2  }
  0x27   :  { %190 = vset.pattern.permute.xlu1 %v207_v9 }
  0x28   :  { %134 = vperm.xlu1 %190, %v11_v2  }
  0x2c   :  { %138 = vperm.xlu1 %190, %v12_v3  }
  0x81   :  { %v39_v10 = vpop.permute.xlu1 %38  ;;  %v22_v14 = vpop.permute.xlu0 %21 }
  0x82   :  { %v33_v23 = vmul.f32 %v32_v20, %v22_v14  ;;  %v49_v36 = vmul.f32 %v48_v28, %v39_v10 }
  0x84   :  { %v35_v32 = vadd.f32 %v168_v26, %v33_v23 }
  0x85   :  { %v43_v12 = vpop.permute.xlu1 %42  ;;  %v27_v18 = vpop.permute.xlu0 %26 }
  0x86   :  { %v34_v29 = vmul.f32 %v32_v20, %v27_v18  ;;  %v50_v41 = vmul.f32 %v48_v28, %v43_v12  ;;  %v51_v42 = vadd.f32 %v49_v36, %v35_v32 }
  0x88   :  { %v36_v37 = vadd.f32 %v168_v26, %v34_v29 }
  0x8a   :  { %v59_v15 = vpop.permute.xlu1 %58  ;;  %v55_v27 = vpop.permute.xlu0 %54  ;;  %v52_v47 = vadd.f32 %v50_v41, %v36_v37 }
  0x8b   :  { %v65_v38 = vmul.f32 %v64_v30, %v55_v27  ;;  %v66_v48 = vmul.f32 %v64_v30, %v59_v15 }
  0x8d   :  { %v67_v49 = vadd.f32 %v65_v38, %v51_v42  ;;  %v68_v56 = vadd.f32 %v66_v48, %v52_v47 }
  0x8f   :  { %v71_v19 = vpop.permute.xlu1 %70  ;;  %v75_v40 = vpop.permute.xlu0 %74 }
  0x90   :  { %v81_v43 = vmul.f32 %v80_v33, %v71_v19  ;;  %v82_v53 = vmul.f32 %v80_v33, %v75_v40 }
  0x92   :  { %v83_v52 = vadd.f32 %v81_v43, %v67_v49  ;;  %v84_v61 = vadd.f32 %v82_v53, %v68_v56 }
  0x94   :  { %v87_v25 = vpop.permute.xlu1 %86  ;;  %v103_v51 = vpop.permute.xlu0 %102 }
  0x95   :  { %v97_v50 = vmul.f32 %v96_v39, %v87_v25  ;;  %v113_v58 = vmul.f32 %v112_v44, %v103_v51 }
  0x97   :  { %v99_v57 = vadd.f32 %v97_v50, %v83_v52 }
  0x98   :  { %v91_v34 = vpop.permute.xlu1 %90 }
  0x99   :  { %v98_v59 = vmul.f32 %v96_v39, %v91_v34  ;;  %v123_v1 = vpop.permute.xlu0 %122  ;;  %v115_v2 = vadd.f32 %v113_v58, %v99_v57 }
  0x9a   :  { %v130_v6 = vmul.f32 %v128_v55, %v123_v1 }
  0x9b   :  { %v100_v3 = vadd.f32 %v98_v59, %v84_v61 }
  0x9d   :  { %v107_v45 = vpop.permute.xlu1 %106 }
  0x9e   :  { %v114_v62 = vmul.f32 %v112_v44, %v107_v45 }
  0xa0   :  { %v116_v5 = vadd.f32 %v114_v62, %v100_v3 }
  0xa2   :  { %v119_v60 = vpop.permute.xlu1 %118  ;;  %v132_v11 = vadd.f32 %v130_v6, %v116_v5 }
  0xa3   :  { %v129_v63 = vmul.f32 %v128_v55, %v119_v60 }
  0xa5   :  { %v131_v7 = vadd.f32 %v129_v63, %v115_v2 }
  0xa7   :  { %v135_v4 = vpop.permute.xlu1 %134 }
  0xa8   :  { %v145_v8 = vmul.f32 %v144_v0, %v135_v4 }
  0xaa   :  { %v147_v9 = vadd.f32 %v145_v8, %v131_v7 }
  0xab   :  { %v139_v10 = vpop.permute.xlu1 %138 }
  0xac   :  { %v169_v12 = vmul.f32 -1.442695, %v147_v9  ;;  %v146_v13 = vmul.f32 %v144_v0, %v139_v10 }
  0xae   :  { %192 = vpow2.f32 %v169_v12  ;;  %v148_v14 = vadd.f32 %v146_v13, %v132_v11 }
  0xb0   :  { %v170_v15 = vmul.f32 -1.442695, %v148_v14 }
  0xb2   :  { %194 = vpow2.f32 %v170_v15 }
  0xb8   :  { %v193_v16 = vpop.eup %192 }
  0xb9   :  { %v155_v18 = vadd.f32 1.0, %v193_v16 }
  0xbb   :  { %196 = vrcp.f32 %v155_v18 }
  0xbc   :  { %v195_v17 = vpop.eup %194 }
  0xbd   :  { %v156_v19 = vadd.f32 1.0, %v195_v17 }
  0xbf   :  { %198 = vrcp.f32 %v156_v19 }
  0xc5   :  { %v197_v20 = vpop.eup %196 }
  0xc6   :  { %162 = vst.msk [vmem:[%s243_s2] sm:$0xff] %vm161_vm0, %v197_v20 }
  0xc9   :  { %v199_v21 = vpop.eup %198 }
  0xca   :  { %163 = vst.msk [vmem:[%s243_s2 + $0x8] sm:$0xff] %vm161_vm0, %v199_v21 }

</bundles_post_ra>
